<compile_context>
chip_gen: v6e
topology: v6e:2x2x1
jax: 0.10.0
libtpu: 0.0.40
codegen_flags: <defaults>
</compile_context>

<pallas_src>
import jax
import jax.numpy as jnp
from jax.experimental import pallas as pl
from jax.experimental.pallas import tpu as pltpu

TILE_B = 8        # batch rows per grid step (one f32 sublane group)
LANE = 128        # TPU lane width
NEG_MASK = -1e30  # finite mask value for padded vocab columns


def _round_up(x, m):
    return (x + m - 1) // m * m


def sg_nn_kernel(idx_ref, emb_ref, w_ref, b_ref, out_ref, x_sc):
    """One grid step: TILE_B batch rows, full (lane-padded) vocab.

    idx_ref : (B_pad,)        int32  SMEM (scalar prefetch) word indices
    emb_ref : (V, E_pad)      f32    VMEM embedding table
    w_ref   : (E_pad, V_pad)  f32    VMEM Linear weight, pre-transposed
    b_ref   : (1, V_pad)      f32    VMEM Linear bias (-1e30 on padded cols)
    out_ref : (TILE_B, V_pad) f32    log-softmax(logits)
    x_sc    : (TILE_B, E_pad) f32    VMEM scratch: gathered embeddings
    """
    base = pl.program_id(0) * TILE_B

    # Embedding gather: one dynamic-row copy per batch row.  Indices come from
    # SMEM (scalar path); the destination slice start is static (unrolled i),
    # only the source row is dynamic.
    for i in range(TILE_B):
        row = idx_ref[base + i]
        x_sc[pl.ds(i, 1), :] = emb_ref[pl.ds(row, 1), :]

    # Linear: x @ W^T + b, vocab on the lane axis, f32 accumulation on the MXU.
    logits = jnp.dot(x_sc[...], w_ref[...],
                     preferred_element_type=jnp.float32) + b_ref[...]

    # Numerically stable log-softmax over the lane-dense vocab axis.  Padded
    # columns sit at ~-1e30: they never win the max and exp() underflows to 0,
    # so the normalizer matches the unpadded math exactly.
    m = jnp.max(logits, axis=-1, keepdims=True)
    shifted = logits - m
    lse = jnp.log(jnp.sum(jnp.exp(shifted), axis=-1, keepdims=True))
    out_ref[...] = shifted - lse


def sg_nn_forward(indices, emb_table, lin_weight, lin_bias):
    """indices: (B,) int; emb_table: (V, E); lin_weight: (V, E); lin_bias: (V,).

    Returns (B, V) f32 log-probabilities (LogSoftmax over the vocab axis),
    matching Embedding -> Linear -> LogSoftmax(dim=1).
    """
    B = indices.shape[0]
    V, E = emb_table.shape

    B_pad = _round_up(max(B, TILE_B), TILE_B)
    V_pad = _round_up(V, LANE)   # lane-dense vocab axis (unmasked stores)
    E_pad = _round_up(E, 8)      # sublane-aligned contraction axis

    f32 = jnp.float32
    # Pad indices with 0 (any valid row): padded batch rows are discarded below.
    idx_p = jnp.zeros((B_pad,), jnp.int32).at[:B].set(indices.astype(jnp.int32))
    emb_p = jnp.zeros((V, E_pad), f32).at[:, :E].set(emb_table.astype(f32))
    w_t_p = jnp.zeros((E_pad, V_pad), f32).at[:E, :V].set(lin_weight.astype(f32).T)
    bias_p = jnp.full((1, V_pad), NEG_MASK, f32).at[0, :V].set(lin_bias.astype(f32))

    grid = (B_pad // TILE_B,)

    out = pl.pallas_call(
        sg_nn_kernel,
        out_shape=jax.ShapeDtypeStruct((B_pad, V_pad), f32),
        grid_spec=pltpu.PrefetchScalarGridSpec(
            num_scalar_prefetch=1,          # indices -> SMEM
            grid=grid,
            in_specs=[
                # Whole table / weight / bias stay VMEM-resident (tiny model);
                # constant index maps mean no re-DMA across grid steps.
                # At large V: tile the last axis here with an online LSE.
                pl.BlockSpec((V, E_pad), lambda b, idx_ref: (0, 0)),
                pl.BlockSpec((E_pad, V_pad), lambda b, idx_ref: (0, 0)),
                pl.BlockSpec((1, V_pad), lambda b, idx_ref: (0, 0)),
            ],
            out_specs=pl.BlockSpec((TILE_B, V_pad), lambda b, idx_ref: (b, 0)),
            scratch_shapes=[pltpu.VMEM((TILE_B, E_pad), f32)],
        ),
        compiler_params=pltpu.CompilerParams(
            # Batch grid axis is independent -> shards across the 2 TCs on v7x.
            dimension_semantics=("parallel",),
            vmem_limit_bytes=32 * 1024 * 1024,  # safe on v5e/v6e/v7x
        ),
    )(idx_p, emb_p, w_t_p, bias_p)

    return out[:B, :V]


if __name__ == "__main__":
    # Small synthetic sizes consistent with the module (embedding_dims=5,
    # vocab from the toy dataset, a batch of centre-word indices).
    vocab_size = 50        # not a multiple of 128 -> exercises lane padding/masking
    embedding_dims = 5
    batch = 20             # not a multiple of TILE_B -> exercises batch padding

    key = jax.random.PRNGKey(0)
    k_emb, k_w, k_b, k_idx = jax.random.split(key, 4)

    # nn.Embedding.weight ~ N(0, 1)
    emb_table = jax.random.normal(k_emb, (vocab_size, embedding_dims),
                                  dtype=jnp.float32)
    # nn.Linear init ~ U(-1/sqrt(fan_in), 1/sqrt(fan_in))
    bound = 1.0 / (embedding_dims ** 0.5)
    lin_weight = jax.random.uniform(k_w, (vocab_size, embedding_dims),
                                    minval=-bound, maxval=bound, dtype=jnp.float32)
    lin_bias = jax.random.uniform(k_b, (vocab_size,),
                                  minval=-bound, maxval=bound, dtype=jnp.float32)
    indices = jax.random.randint(k_idx, (batch,), 0, vocab_size, dtype=jnp.int32)

    out = sg_nn_forward(indices, emb_table, lin_weight, lin_bias)
    out = jax.block_until_ready(out)

    # Pure-JAX reference (same math as the PyTorch module's forward).
    ref = jax.nn.log_softmax(emb_table[indices] @ lin_weight.T + lin_bias, axis=-1)
    assert out.shape == (batch, vocab_size)
    assert jnp.allclose(out, ref, atol=1e-5), "mismatch vs reference"

    print("KERNEL_OK")
</pallas_src>

<mosaic_0001>
module attributes {stable_mosaic.version = 11 : i64} {
  func.func @sg_nn_kernel(%arg0: i32, %arg1: memref<24xi32, #tpu.memory_space<smem>>, %arg2: memref<50x8xf32, #tpu.memory_space<vmem>>, %arg3: memref<8x128xf32, #tpu.memory_space<vmem>>, %arg4: memref<1x128xf32, #tpu.memory_space<vmem>>, %arg5: memref<8x128xf32, #tpu.memory_space<vmem>>, %arg6: memref<8x8xf32, #tpu.memory_space<vmem>>) attributes {dimension_semantics = [#tpu.dimension_semantics<parallel>], iteration_bounds = array<i64: 3>, scalar_prefetch = 1 : i64, scratch_operands = 1 : i64, tpu.core_type = #tpu.core_type<tc>, window_params = [{pipeline_mode = #tpu.pipeline_mode<synchronous>, transform_indices = @transform_0, window_bounds = array<i64: 50, 8>}, {pipeline_mode = #tpu.pipeline_mode<synchronous>, transform_indices = @transform_1, window_bounds = array<i64: 8, 128>}, {pipeline_mode = #tpu.pipeline_mode<synchronous>, transform_indices = @transform_2, window_bounds = array<i64: 1, 128>}, {transform_indices = @transform_3, window_bounds = array<i64: 8, 128>}]} {
    %c8_i32 = arith.constant 8 : i32
    %0 = arith.muli %arg0, %c8_i32 : i32
    %c0_i32 = arith.constant 0 : i32
    %1 = arith.addi %0, %c0_i32 : i32
    %2 = arith.index_cast %1 : i32 to index
    %3 = memref.load %arg1[%2] : memref<24xi32, #tpu.memory_space<smem>>
    %4 = arith.index_cast %3 : i32 to index
    %c0 = arith.constant 0 : index
    %5 = vector.load %arg2[%4, %c0] : memref<50x8xf32, #tpu.memory_space<vmem>>, vector<1x8xf32>
    %c0_0 = arith.constant 0 : index
    %c0_1 = arith.constant 0 : index
    %6 = vector.load %arg6[%c0_0, %c0_1] : memref<8x8xf32, #tpu.memory_space<vmem>>, vector<1x8xf32>
    tpu.vector_store %arg6[%c0_0, %c0_1], %5 {strides = array<i32>} : memref<8x8xf32, #tpu.memory_space<vmem>>, vector<1x8xf32>,
    %c1_i32 = arith.constant 1 : i32
    %7 = arith.addi %0, %c1_i32 : i32
    %8 = arith.index_cast %7 : i32 to index
    %9 = memref.load %arg1[%8] : memref<24xi32, #tpu.memory_space<smem>>
    %10 = arith.index_cast %9 : i32 to index
    %c0_2 = arith.constant 0 : index
    %11 = vector.load %arg2[%10, %c0_2] : memref<50x8xf32, #tpu.memory_space<vmem>>, vector<1x8xf32>
    %c1 = arith.constant 1 : index
    %c0_3 = arith.constant 0 : index
    %12 = vector.load %arg6[%c1, %c0_3] : memref<8x8xf32, #tpu.memory_space<vmem>>, vector<1x8xf32>
    tpu.vector_store %arg6[%c1, %c0_3], %11 {strides = array<i32>} : memref<8x8xf32, #tpu.memory_space<vmem>>, vector<1x8xf32>,
    %c2_i32 = arith.constant 2 : i32
    %13 = arith.addi %0, %c2_i32 : i32
    %14 = arith.index_cast %13 : i32 to index
    %15 = memref.load %arg1[%14] : memref<24xi32, #tpu.memory_space<smem>>
    %16 = arith.index_cast %15 : i32 to index
    %c0_4 = arith.constant 0 : index
    %17 = vector.load %arg2[%16, %c0_4] : memref<50x8xf32, #tpu.memory_space<vmem>>, vector<1x8xf32>
    %c2 = arith.constant 2 : index
    %c0_5 = arith.constant 0 : index
    %18 = vector.load %arg6[%c2, %c0_5] : memref<8x8xf32, #tpu.memory_space<vmem>>, vector<1x8xf32>
    tpu.vector_store %arg6[%c2, %c0_5], %17 {strides = array<i32>} : memref<8x8xf32, #tpu.memory_space<vmem>>, vector<1x8xf32>,
    %c3_i32 = arith.constant 3 : i32
    %19 = arith.addi %0, %c3_i32 : i32
    %20 = arith.index_cast %19 : i32 to index
    %21 = memref.load %arg1[%20] : memref<24xi32, #tpu.memory_space<smem>>
    %22 = arith.index_cast %21 : i32 to index
    %c0_6 = arith.constant 0 : index
    %23 = vector.load %arg2[%22, %c0_6] : memref<50x8xf32, #tpu.memory_space<vmem>>, vector<1x8xf32>
    %c3 = arith.constant 3 : index
    %c0_7 = arith.constant 0 : index
    %24 = vector.load %arg6[%c3, %c0_7] : memref<8x8xf32, #tpu.memory_space<vmem>>, vector<1x8xf32>
    tpu.vector_store %arg6[%c3, %c0_7], %23 {strides = array<i32>} : memref<8x8xf32, #tpu.memory_space<vmem>>, vector<1x8xf32>,
    %c4_i32 = arith.constant 4 : i32
    %25 = arith.addi %0, %c4_i32 : i32
    %26 = arith.index_cast %25 : i32 to index
    %27 = memref.load %arg1[%26] : memref<24xi32, #tpu.memory_space<smem>>
    %28 = arith.index_cast %27 : i32 to index
    %c0_8 = arith.constant 0 : index
    %29 = vector.load %arg2[%28, %c0_8] : memref<50x8xf32, #tpu.memory_space<vmem>>, vector<1x8xf32>
    %c4 = arith.constant 4 : index
    %c0_9 = arith.constant 0 : index
    %30 = vector.load %arg6[%c4, %c0_9] : memref<8x8xf32, #tpu.memory_space<vmem>>, vector<1x8xf32>
    tpu.vector_store %arg6[%c4, %c0_9], %29 {strides = array<i32>} : memref<8x8xf32, #tpu.memory_space<vmem>>, vector<1x8xf32>,
    %c5_i32 = arith.constant 5 : i32
    %31 = arith.addi %0, %c5_i32 : i32
    %32 = arith.index_cast %31 : i32 to index
    %33 = memref.load %arg1[%32] : memref<24xi32, #tpu.memory_space<smem>>
    %34 = arith.index_cast %33 : i32 to index
    %c0_10 = arith.constant 0 : index
    %35 = vector.load %arg2[%34, %c0_10] : memref<50x8xf32, #tpu.memory_space<vmem>>, vector<1x8xf32>
    %c5 = arith.constant 5 : index
    %c0_11 = arith.constant 0 : index
    %36 = vector.load %arg6[%c5, %c0_11] : memref<8x8xf32, #tpu.memory_space<vmem>>, vector<1x8xf32>
    tpu.vector_store %arg6[%c5, %c0_11], %35 {strides = array<i32>} : memref<8x8xf32, #tpu.memory_space<vmem>>, vector<1x8xf32>,
    %c6_i32 = arith.constant 6 : i32
    %37 = arith.addi %0, %c6_i32 : i32
    %38 = arith.index_cast %37 : i32 to index
    %39 = memref.load %arg1[%38] : memref<24xi32, #tpu.memory_space<smem>>
    %40 = arith.index_cast %39 : i32 to index
    %c0_12 = arith.constant 0 : index
    %41 = vector.load %arg2[%40, %c0_12] : memref<50x8xf32, #tpu.memory_space<vmem>>, vector<1x8xf32>
    %c6 = arith.constant 6 : index
    %c0_13 = arith.constant 0 : index
    %42 = vector.load %arg6[%c6, %c0_13] : memref<8x8xf32, #tpu.memory_space<vmem>>, vector<1x8xf32>
    tpu.vector_store %arg6[%c6, %c0_13], %41 {strides = array<i32>} : memref<8x8xf32, #tpu.memory_space<vmem>>, vector<1x8xf32>,
    %c7_i32 = arith.constant 7 : i32
    %43 = arith.addi %0, %c7_i32 : i32
    %44 = arith.index_cast %43 : i32 to index
    %45 = memref.load %arg1[%44] : memref<24xi32, #tpu.memory_space<smem>>
    %46 = arith.index_cast %45 : i32 to index
    %c0_14 = arith.constant 0 : index
    %47 = vector.load %arg2[%46, %c0_14] : memref<50x8xf32, #tpu.memory_space<vmem>>, vector<1x8xf32>
    %c7 = arith.constant 7 : index
    %c0_15 = arith.constant 0 : index
    %48 = vector.load %arg6[%c7, %c0_15] : memref<8x8xf32, #tpu.memory_space<vmem>>, vector<1x8xf32>
    tpu.vector_store %arg6[%c7, %c0_15], %47 {strides = array<i32>} : memref<8x8xf32, #tpu.memory_space<vmem>>, vector<1x8xf32>,
    %c0_16 = arith.constant 0 : index
    %c0_17 = arith.constant 0 : index
    %49 = vector.load %arg6[%c0_16, %c0_17] : memref<8x8xf32, #tpu.memory_space<vmem>>, vector<8x8xf32>
    %c0_18 = arith.constant 0 : index
    %c0_19 = arith.constant 0 : index
    %50 = vector.load %arg3[%c0_18, %c0_19] : memref<8x128xf32, #tpu.memory_space<vmem>>, vector<8x128xf32>
    %cst = arith.constant dense<0.000000e+00> : vector<8x128xf32>
    %51 = tpu.matmul %49, %50, %cst {dimension_numbers = #tpu.dot_dimension_numbers<[1], [0], [0], [1], [0, 0, 1, 1], [], []>} : vector<8x8xf32>, vector<8x128xf32>, vector<8x128xf32> -> vector<8x128xf32>
    %c0_20 = arith.constant 0 : index
    %c0_21 = arith.constant 0 : index
    %52 = vector.load %arg4[%c0_20, %c0_21] : memref<1x128xf32, #tpu.memory_space<vmem>>, vector<1x128xf32>
    %53 = vector.broadcast %52 : vector<1x128xf32> to vector<8x128xf32>
    %54 = arith.addf %51, %53 : vector<8x128xf32>
    %cst_22 = arith.constant dense<0xFF800000> : vector<8xf32>
    %55 = vector.multi_reduction <maximumf>, %54, %cst_22 [1] : vector<8x128xf32> to vector<8xf32>
    %56 = vector.shape_cast %55 : vector<8xf32> to vector<8x1xf32>
    %57 = vector.broadcast %56 : vector<8x1xf32> to vector<8x128xf32>
    %58 = arith.subf %54, %57 : vector<8x128xf32>
    %59 = math.exp %58 : vector<8x128xf32>
    %cst_23 = arith.constant dense<0.000000e+00> : vector<8xf32>
    %60 = vector.multi_reduction <add>, %59, %cst_23 [1] : vector<8x128xf32> to vector<8xf32>
    %61 = vector.shape_cast %60 : vector<8xf32> to vector<8x1xf32>
    %62 = math.log %61 : vector<8x1xf32>
    %63 = vector.broadcast %62 : vector<8x1xf32> to vector<8x128xf32>
    %64 = arith.subf %58, %63 : vector<8x128xf32>
    %c0_24 = arith.constant 0 : index
    %c0_25 = arith.constant 0 : index
    %65 = vector.load %arg5[%c0_24, %c0_25] : memref<8x128xf32, #tpu.memory_space<vmem>>, vector<8x128xf32>
    tpu.vector_store %arg5[%c0_24, %c0_25], %64 {strides = array<i32>} : memref<8x128xf32, #tpu.memory_space<vmem>>, vector<8x128xf32>,
    return
  }
  func.func @transform_0(%arg0: i32, %arg1: memref<24xi32, #tpu.memory_space<smem>>) -> (i32, i32) {
    %c0_i32 = arith.constant 0 : i32
    %c0_i32_0 = arith.constant 0 : i32
    %c0_i32_1 = arith.constant 0 : i32
    return %c0_i32, %c0_i32_0 : i32, i32
  }
  func.func @transform_1(%arg0: i32, %arg1: memref<24xi32, #tpu.memory_space<smem>>) -> (i32, i32) {
    %c0_i32 = arith.constant 0 : i32
    %c0_i32_0 = arith.constant 0 : i32
    %c0_i32_1 = arith.constant 0 : i32
    return %c0_i32, %c0_i32_0 : i32, i32
  }
  func.func @transform_2(%arg0: i32, %arg1: memref<24xi32, #tpu.memory_space<smem>>) -> (i32, i32) {
    %c0_i32 = arith.constant 0 : i32
    %c0_i32_0 = arith.constant 0 : i32
    %c0_i32_1 = arith.constant 0 : i32
    return %c0_i32, %c0_i32_0 : i32, i32
  }
  func.func @transform_3(%arg0: i32, %arg1: memref<24xi32, #tpu.memory_space<smem>>) -> (i32, i32) {
    %c0_i32 = arith.constant 0 : i32
    %c0_i32_0 = arith.constant 0 : i32
    return %arg0, %c0_i32 : i32, i32
  }
}

</mosaic_0001>

<bundles_post_ra>
// kernel: tpu_custom_call.1
= control target key start
LH: loop header
LB: loop body
LE: loop exit
PB: predicated region body
PF: predicated region fallthrough
CT: control target
= control target key end

     0   :  { %s653_s0 = inlined_call_operand.vmem [shape: s32[24], index: 0, kind: input, shape index: {}]   ;;  %s654_s1 = inlined_call_operand.vmem [shape: f32[50,8], index: 1, kind: input, shape index: {}]   ;;  %s655_s2 = inlined_call_operand.vmem [shape: f32[8,128], index: 2, kind: input, shape index: {}]   ;;  %s656_s3 = inlined_call_operand.vmem [shape: f32[1,128], index: 3, kind: input, shape index: {}]   ;;  %s657_s4 = inlined_call_operand.hbm [shape: f32[24,128], index: 4, kind: output, shape index: {}]  }
   0x1   :  { %658 = sst [smem:[#allocation10_spill]] %s655_s2  ;;  %s9_s17 = sshll.u32 %s653_s0, 4  ;;  %s10_s17 = int_to_ptr.vmem [resolvable:$true] %s9_s17 }
   0x2   :  { %s424_s18 = scalar_lea.vmem %s10_s17, 16  ;;  %p429_p1 = scmp.lt.s32.totalorder %s10_s17, %s10_s17 }
   0x3   :  { %p425_p0 = scmp.ne.s32.totalorder %s10_s17, %s424_s18  ;;  %p430_p2 = scmp.lt.s32.totalorder %s424_s18, %s424_s18 }
   0x5   :  { %p431_p3 = por %p430_p2, %p429_p1 }
   0x7   :  { %p432_p4 = pnand %p431_p3, %p425_p0 }
   0x9   :  { %435 = shalt.err (!%p432_p4)  }
   0xa   :  { %s500_s19 = smov [#allocation4]  }
   0xb   :  { %12 = dma.vmem_to_smem %s10_s17, 16, %s500_s19, [#allocation3] }
   0xc   :  { %478 = dma.done.wait [#allocation3], 16 }
   0xd   :  { %479 = vsyncadd [#allocation3], 4294967280 }
   0xe   :  { %14 = sfence }
   0xf   :  { %15 = vsyncpa [#allocation6], 0 }
  0x10   :  { %17 = vsyncpa [#allocation6 + $0x1], 0  ;;  %s532_s20 = smov 0   ;;  %s534_s21 = smov 0  }
  0x11   :  { %s536_s0 = smov 0   ;;  %s538_s22 = smov 0  }
  0x12 LB: > { %s553_s23 = sadd.s32 4294967295, %s498_s22   ;;  %s360_s24 = sadd.s32 4294967294, %s498_s22   ;;  %s498_s22 = sphi %s538_s22, %s667_s22   ;;  %s494_s0 = sphi %s536_s0, %s666_s0   ;;  %s490_s21 = sphi %s534_s21, %s665_s21   ;;  %s486_s20 = sphi %s532_s20, %s664_s20  }
  0x13   : > { %s557_s25 = sadd.s32 1, %s498_s22   ;;  %s93_s26 = sadd.s32 1, %s494_s0 }
  0x14   : > { %s90_s27 = ssub.s32 %s498_s22, %s557_s25  ;;  %p103_p5 = scmp.ne.s32.totalorder %s494_s0, %s490_s21 }
  0x15   : > { %p91_p6 = scmp.eq.s32.totalorder %s90_s27, 0  ;;  %p104_p7 = scmp.eq.s32.totalorder %s553_s23, 2 }
  0x16   : > { %p109_p8 = scmp.ne.s32.totalorder %s490_s21, %s486_s20  ;;  %p110_p9 = scmp.eq.s32.totalorder %s360_s24, 2 }
  0x17   : > { %s568_s28 = scalar_select %p91_p6, %s494_s0, %s93_s26  }
  0x18   : > { %p570_p10 = por %p104_p7, %p103_p5  ;;  %p574_p11 = por %p110_p9, %p109_p8 }
  0x19   : > { %659 = sst [smem:[#allocation9_spill]] %s568_s28  ;;  %p362_p12 = scmp.ge.s32.totalorder %s498_s22, 1 }
  0x1a   : > { %p137_p13 = scmp.lt.s32.totalorder %s498_s22, 4 }
  0x1c   : > { %p138_p0 = pnand %p362_p12, %p137_p13 }
  0x1d   : > { %s662_s2 = sld [smem:[#allocation10_spill]] (!%p138_p0)  ;;  %s364_s7 = sshll.u32 (!%p138_p0), %s553_s23, 3 }
  0x1e   : > { %141 = sbr.rel (%p138_p0) target bundleno = 574 (0x23e), region = 32  ;;  %s157_s8 = sld [smem:[#allocation4 + %s364_s7]] (!%p138_p0) }
  0x1f   : > { %s162_s9 = sadd.s32 (!%p138_p0), 1, %s364_s7  ;;  %s167_s11 = sadd.s32 (!%p138_p0), 2, %s364_s7 }
  0x20   : > { %s163_s10 = sld [smem:[#allocation4 + %s162_s9]] (!%p138_p0)  ;;  %s172_s13 = sadd.s32 (!%p138_p0), 3, %s364_s7 }
  0x21   : > { %s168_s12 = sld [smem:[#allocation4 + %s167_s11]] (!%p138_p0)  ;;  %s177_s15 = sadd.s32 (!%p138_p0), 4, %s364_s7 }
  0x22   : > { %s173_s14 = sld [smem:[#allocation4 + %s172_s13]] (!%p138_p0)  ;;  %s182_s17 = sadd.s32 (!%p138_p0), 5, %s364_s7 }
  0x23   : > { %v198_v0 = vld [vmem:[%s662_s2] sm:$0xff]  ;;  %v501_v1 = vmov 0.0   ;;  %vm502_vm0 = vmmov 0   ;;  %s178_s16 = sld [smem:[#allocation4 + %s177_s15]]  ;;  %vm160_vm1 = vcmask 57344   ;;  %s187_s19 = sadd.s32 6, %s364_s7 }
  0x24   : > { %373 = vmatprep.subr.mxu0 %v501_v1  ;;  %375 = vmatprep.mubr.msk.f32.mxu0 %vm502_vm0, %v501_v1  ;;  %s183_s18 = sld [smem:[#allocation4 + %s182_s17]]  ;;  %s158_s27 = scalar_lea.vmem %s654_s1, %s157_s8  ;;  %vm206_vm2 = vcmask 64512   ;;  %v365_v11 = vld [vmem:[%s656_s3] ss:$0 sm:$0xff] }
  0x25   : > { %374 = vmatpush3.msra.mxu0 %v198_v0  ;;  %s188_s5 = sld [smem:[#allocation4 + %s187_s19]]  ;;  %v159_v2 = vld [vmem:[%s158_s27] sm:$0x1]  ;;  %s192_s28 = sadd.s32 7, %s364_s7 }
  0x26   : > { %s164_s9 = scalar_lea.vmem %s654_s1, %s163_s10  ;;  %161 = vst.msk [vmem:[#allocation2] sm:$0x1] %vm160_vm1, %v159_v2  ;;  %s193_s17 = sld [smem:[#allocation4 + %s192_s28]] }
  0x27   : > { %v165_v3 = vld [vmem:[%s164_s9] sm:$0x1]  ;;  %s169_s15 = scalar_lea.vmem %s654_s1, %s168_s12  ;;  %s503_s12 = smov [#allocation5]  }
  0x28   : > { %166 = vst.msk [vmem:[#allocation2 + $0x1] sm:$0x1] %vm160_vm1, %v165_v3  ;;  %v170_v4 = vld [vmem:[%s169_s15] sm:$0x1]  ;;  %s174_s19 = scalar_lea.vmem %s654_s1, %s173_s14 }
  0x29   : > { %171 = vst.msk [vmem:[#allocation2 + $0x2] sm:$0x1] %vm160_vm1, %v170_v4  ;;  %v175_v5 = vld [vmem:[%s174_s19] sm:$0x1]  ;;  %s179_s10 = scalar_lea.vmem %s654_s1, %s178_s16 }
  0x2a   : > { %176 = vst.msk [vmem:[#allocation2 + $0x3] sm:$0x1] %vm160_vm1, %v175_v5  ;;  %v180_v6 = vld [vmem:[%s179_s10] sm:$0x1]  ;;  %s184_s28 = scalar_lea.vmem %s654_s1, %s183_s18 }
  0x2b   : > { %181 = vst.msk [vmem:[#allocation2 + $0x4] sm:$0x1] %vm160_vm1, %v180_v6  ;;  %v185_v7 = vld [vmem:[%s184_s28] sm:$0x1]  ;;  %s189_s14 = scalar_lea.vmem %s654_s1, %s188_s5  ;;  %s153_s5 = sand.u32 1, %s490_s21  }
  0x2c   : > { %186 = vst.msk [vmem:[#allocation2 + $0x5] sm:$0x1] %vm160_vm1, %v185_v7  ;;  %v190_v8 = vld [vmem:[%s189_s14] sm:$0x1]  ;;  %s194_s11 = scalar_lea.vmem %s654_s1, %s193_s17  ;;  %s363_s15 = sshll.u32 %s153_s5, 3 }
  0x2d   : > { %191 = vst.msk [vmem:[#allocation2 + $0x6] sm:$0x1] %vm160_vm1, %v190_v8  ;;  %v195_v9 = vld [vmem:[%s194_s11] sm:$0x1]  ;;  %s368_s17 = sshll.u32 %s553_s23, 7  ;;  %s155_s24 = scalar_lea.vmem [#allocation5], %s363_s15 }
  0x2e   : > { %196 = vst.msk [vmem:[#allocation2 + $0x7] sm:$0x1] %vm160_vm1, %v195_v9  ;;  %s305_s8 = sshll.u32 %s155_s24, 4  ;;  %s303_s7 = scalar_lea.hbm %s657_s4, %s368_s17  ;;  %s306_s8 = int_to_ptr.vmem [resolvable:$true] %s305_s8 }
  0x2f   : > { %s292_s10 = scalar_lea.sflag [#allocation6], %s153_s5  ;;  %s436_s26 = scalar_lea.vmem %s306_s8, 128 }
  0x30   : > { %p437_p1 = scmp.ne.s32.totalorder %s306_s8, %s436_s26  ;;  %s440_s28 = sshll.u32 %s503_s12, 4  ;;  %s441_s28 = int_to_ptr.vmem [resolvable:$false] %s440_s28 }
  0x31   : > { %s442_s23 = scalar_lea.vmem %s441_s28, 256  ;;  %p443_p4 = scmp.lt.s32.totalorder %s306_s8, %s441_s28 }
  0x32   : > { %p438_p2 = pnand %p437_p1, %p570_p10  ;;  %p444_p5 = scmp.lt.s32.totalorder %s442_s23, %s436_s26 }
  0x34   : > { %p439_p3 = pneg %p438_p2  ;;  %p445_p6 = por %p444_p5, %p443_p4 }
  0x35   : > { %v197_v10 = vld [vmem:[#allocation2] sm:$0xff] }
  0x36   : > { %376 = vmatmul.mubr.msk.f32.vlgmr.msra.gmra.mxu0 %vm206_vm2, %v197_v10  ;;  %p446_p7 = pnand %p445_p6, %p439_p3 }
  0xf6   : > { %v276_v12 = vpop.f32.mrf.mxu0 }
  0xf7   : > { %v277_v13 = vadd.f32 %v365_v11, %v276_v12 }
  0xf8   : > { %v377_v14 = vpop.f32.mrf.mxu0 }
  0xf9   : > { %280 = vmax.xlane.f32.xlu0 %v277_v13 }
 0x182   : > { %v281_v15 = vpop.xlane.xlu0 %280 }
 0x183   : > { %v282_v16 = vsub.f32 %v277_v13, %v281_v15 }
 0x185   : > { %v283_v17 = vmul.f32 1.442695, %v282_v16 }
 0x187   : > { %420 = vpow2.f32 %v283_v17 }
 0x194   : > { %v421_v18 = vpop.eup %420 }
 0x195   : > { %285 = vadd.xlane.f32.xlu0 %v421_v18 }
 0x21e   : > { %v286_v19 = vpop.xlane.xlu0 %285 }
 0x21f   : > { %422 = vlog2.f32 %v286_v19 }
 0x22c   : > { %v423_v20 = vpop.eup %422 }
 0x22d   : > { %v288_v21 = vmul.f32 0.6931472, %v423_v20 }
 0x22f   : > { %v289_v22 = vsub.f32 %v282_v16, %v288_v21 }
 0x231   : > { %290 = vst [vmem:[%s155_s24] sm:$0xff] %v289_v22 }
 0x232   : > { %449 = shalt.err (!%p446_p7)
}
 0x233   : > { %s450_s27 = scalar_lea.hbm %s303_s7, 128  ;;  %s454_s16 = scalar_lea.hbm %s657_s4, 384 }
 0x234   : > { %p451_p8 = scmp.ne.s32.totalorder %s303_s7, %s450_s27  ;;  %p455_p13 = scmp.lt.s32.totalorder %s303_s7, %s657_s4 }
 0x235   : > { %p456_p0 = scmp.lt.s32.totalorder %s454_s16, %s450_s27 }
 0x236   : > { %p452_p9 = pnand %p451_p8, %p570_p10 }
 0x237   : > { %p457_p1 = por %p456_p0, %p455_p13 }
 0x238   : > { %p453_p12 = pneg %p452_p9 }
 0x23a   : > { %p458_p2 = pnand %p457_p1, %p453_p12 }
 0x23c   : > { %461 = shalt.err (!%p458_p2)
}
 0x23d   : > { %378 = dma.vmem_to_hbm [thread:$0]  (%p570_p10), %s306_s8, 128, %s303_s7, %s292_s10  }
 0x23e PF: > { %p384_p3 = scmp.ge.s32.totalorder %s498_s22, 2  ;;  %s317_s18 = sand.u32 1, %s486_s20  }
 0x23f   : > { %s318_s13 = scalar_lea.sflag [#allocation6], %s317_s18 }
 0x240   : > { %p381_p4 = pnand %p384_p3, %p574_p11 }
 0x242   : > { %p382_p5 = pneg %p381_p4 }
 0x244   : > { %481 = dma.done.wait (%p382_p5), %s318_s13, 128  }
 0x245   : > { %483 = vsyncadd (%p382_p5), %s318_s13, 4294967168  ;;  %s663_s5 = sld [smem:[#allocation9_spill]]  ;;  %p20_p6 = scmp.ge.s32.totalorder %s557_s25, 5  }
 0x246   : > { %s664_s20 = smov %s490_s21  ;;  %s665_s21 = smov %s494_s0 }
 0x247   : > { %s667_s22 = smov %s557_s25  ;;  %22 = sbr.rel (!%p20_p6) target bundleno = 18 (0x12), region = 72 }
 0x24b   : > { %s666_s0 = smov %s663_s5 }
 0x24c   :  { %323 = vsyncpa [#allocation6], 1 }
 0x24d   :  { %325 = vsyncpa [#allocation6 + $0x1], 1 }

</bundles_post_ra>
